<compile_context>
chip_gen: v6e
topology: v6e:2x2x1
jax: 0.10.0
libtpu: 0.0.40
codegen_flags: <defaults>
</compile_context>

<pallas_src>
import functools

import jax
import jax.numpy as jnp
from jax import lax
from jax.experimental import pallas as pl
from jax.experimental.pallas import tpu as pltpu


# ----------------------------------------------------------------------------
# Generic tiled matmul + bias:  out(M,N) = x(M,K) @ w(K,N) + b(1,N)
# Used for both the hoisted LSTM input projection and the decoder.
# ----------------------------------------------------------------------------
def _matmul_bias_kernel(x_ref, w_ref, b_ref, o_ref, acc_ref):
    k = pl.program_id(2)

    @pl.when(k == 0)
    def _():
        acc_ref[...] = jnp.zeros_like(acc_ref)

    acc_ref[...] += jnp.dot(x_ref[...].astype(w_ref.dtype), w_ref[...],
                            preferred_element_type=jnp.float32)

    @pl.when(k == pl.num_programs(2) - 1)
    def _():
        o_ref[...] = (acc_ref[...] + b_ref[...]).astype(o_ref.dtype)


def _pick_tile(dim, cap, align):
    """Largest tile <= cap that divides dim and is a multiple of align (else full dim)."""
    if dim <= cap:
        return dim
    t = (cap // align) * align
    while t >= align:
        if dim % t == 0:
            return t
        t -= align
    return dim


def matmul_bias(x, w, b, *, out_dtype=jnp.float32,
                tm_cap=512, tn_cap=512, tk_cap=512):
    """x: (M, K) f32; w: (K, N) bf16/f32; b: (1, N) f32."""
    M, K = x.shape
    _, N = w.shape
    tm = _pick_tile(M, tm_cap, 8)
    tn = _pick_tile(N, tn_cap, 128)
    tk = _pick_tile(K, tk_cap, 128)
    grid = (M // tm, N // tn, K // tk)

    return pl.pallas_call(
        _matmul_bias_kernel,
        out_shape=jax.ShapeDtypeStruct((M, N), out_dtype),
        grid_spec=pltpu.PrefetchScalarGridSpec(
            num_scalar_prefetch=0,
            grid=grid,
            in_specs=[
                pl.BlockSpec((tm, tk), lambda i, j, k: (i, k)),   # x tile
                pl.BlockSpec((tk, tn), lambda i, j, k: (k, j)),   # w tile
                pl.BlockSpec((1, tn), lambda i, j, k: (0, j)),    # bias tile
            ],
            out_specs=pl.BlockSpec((tm, tn), lambda i, j, k: (i, j)),
            scratch_shapes=[pltpu.VMEM((tm, tn), jnp.float32)],
        ),
        compiler_params=pltpu.CompilerParams(
            dimension_semantics=("parallel", "parallel", "arbitrary"),
            vmem_limit_bytes=48 * 1024 * 1024,   # leaves headroom on v7x (64 MiB VMEM)
        ),
    )(x, w, b)


# ----------------------------------------------------------------------------
# LSTM recurrence: grid over chunks of Tc timesteps, in-kernel unrolled time loop,
# h/c carried in VMEM scratch.  gates_in already contains x @ W_ih + (b_ih + b_hh).
# ----------------------------------------------------------------------------
def _lstm_recurrence_kernel(gin_ref, h0_ref, c0_ref, whh_ref,
                            y_ref, hT_ref, cT_ref,
                            h_sc, c_sc, *, nhid, tc):
    chunk = pl.program_id(0)

    @pl.when(chunk == 0)
    def _():
        h_sc[...] = h0_ref[...]
        c_sc[...] = c0_ref[...]

    def step(t, carry):
        g_in = gin_ref[t]                      # (B, 4H) f32, includes x@W_ih + bias
        h = h_sc[...]                          # (B, H) f32
        c = c_sc[...]                          # (B, H) f32

        # recurrent projection on the MXU (bf16 operands, f32 accumulation)
        gates = g_in + jnp.dot(h.astype(whh_ref.dtype), whh_ref[...],
                               preferred_element_type=jnp.float32)

        # PyTorch gate order [i, f, g, o]; nhid multiple of 128 -> lane-aligned panels
        i_g = jax.nn.sigmoid(gates[:, 0 * nhid:1 * nhid])
        f_g = jax.nn.sigmoid(gates[:, 1 * nhid:2 * nhid])
        g_g = jnp.tanh(gates[:, 2 * nhid:3 * nhid])
        o_g = jax.nn.sigmoid(gates[:, 3 * nhid:4 * nhid])

        c_new = f_g * c + i_g * g_g
        h_new = o_g * jnp.tanh(c_new)

        h_sc[...] = h_new
        c_sc[...] = c_new
        y_ref[t] = h_new.astype(y_ref.dtype)
        return carry

    lax.fori_loop(0, tc, step, 0, unroll=True)

    @pl.when(chunk == pl.num_programs(0) - 1)
    def _():
        hT_ref[...] = h_sc[...].astype(hT_ref.dtype)
        cT_ref[...] = c_sc[...].astype(cT_ref.dtype)


def lstm_layer(x, h0, c0, w_ih, w_hh, bias, *, tc=None):
    """x: (T, B, ninp) f32; h0/c0: (B, H) f32; w_ih: (ninp, 4H) bf16; w_hh: (H, 4H) bf16;
    bias: (1, 4H) f32 (= b_ih + b_hh)."""
    T, B, ninp = x.shape
    nhid = h0.shape[-1]

    # (1) Hoisted input projection: one big MXU matmul over all T*B rows (bias folded in).
    gates_in = matmul_bias(x.reshape(T * B, ninp), w_ih, bias)       # (T*B, 4H) f32
    gates_in = gates_in.reshape(T, B, 4 * nhid)

    # (2) Recurrence: Tc timesteps per grid step, time loop unrolled in-kernel.
    if tc is None:
        tc = 1
        for cand in (16, 8, 4, 2, 1):
            if cand <= T and T % cand == 0:
                tc = cand
                break
    n_chunks = T // tc

    kernel = functools.partial(_lstm_recurrence_kernel, nhid=nhid, tc=tc)
    y, hT, cT = pl.pallas_call(
        kernel,
        out_shape=(
            jax.ShapeDtypeStruct((T, B, nhid), jnp.float32),
            jax.ShapeDtypeStruct((B, nhid), jnp.float32),
            jax.ShapeDtypeStruct((B, nhid), jnp.float32),
        ),
        grid_spec=pltpu.PrefetchScalarGridSpec(
            num_scalar_prefetch=0,
            grid=(n_chunks,),
            in_specs=[
                pl.BlockSpec((tc, B, 4 * nhid), lambda i: (i, 0, 0)),  # gates_in chunk
                pl.BlockSpec((B, nhid), lambda i: (0, 0)),             # h0 (fetched once)
                pl.BlockSpec((B, nhid), lambda i: (0, 0)),             # c0 (fetched once)
                pl.BlockSpec((nhid, 4 * nhid), lambda i: (0, 0)),      # W_hh (resident)
            ],
            out_specs=[
                pl.BlockSpec((tc, B, nhid), lambda i: (i, 0, 0)),      # y chunk
                pl.BlockSpec((B, nhid), lambda i: (0, 0)),             # h_T (resident)
                pl.BlockSpec((B, nhid), lambda i: (0, 0)),             # c_T (resident)
            ],
            scratch_shapes=[
                pltpu.VMEM((B, nhid), jnp.float32),                    # h carry
                pltpu.VMEM((B, nhid), jnp.float32),                    # c carry
            ],
        ),
        compiler_params=pltpu.CompilerParams(
            dimension_semantics=("arbitrary",),   # sequential recurrence over time chunks
            vmem_limit_bytes=48 * 1024 * 1024,
        ),
    )(gates_in, h0, c0, w_hh)
    return y, hT, cT


# ----------------------------------------------------------------------------
# Full model (rnn_type='LSTM')
# ----------------------------------------------------------------------------
def init_params(key, ntoken, ninp, nhid, nlayers):
    ks = jax.random.split(key, 2 + 4 * nlayers)
    initrange = 0.1
    params = {
        "encoder_w": jax.random.uniform(ks[0], (ntoken, ninp), jnp.float32,
                                        -initrange, initrange),
        "decoder_w": jax.random.uniform(ks[1], (nhid, ntoken), jnp.float32,
                                        -initrange, initrange).astype(jnp.bfloat16),
        "decoder_b": jnp.zeros((1, ntoken), jnp.float32),
        "lstm": [],
    }
    stdv = 1.0 / jnp.sqrt(nhid)
    for l in range(nlayers):
        in_dim = ninp if l == 0 else nhid
        k0, k1, k2, k3 = ks[2 + 4 * l: 6 + 4 * l]
        w_ih = jax.random.uniform(k0, (in_dim, 4 * nhid), jnp.float32, -stdv, stdv)
        w_hh = jax.random.uniform(k1, (nhid, 4 * nhid), jnp.float32, -stdv, stdv)
        b_ih = jax.random.uniform(k2, (4 * nhid,), jnp.float32, -stdv, stdv)
        b_hh = jax.random.uniform(k3, (4 * nhid,), jnp.float32, -stdv, stdv)
        params["lstm"].append((
            w_ih.astype(jnp.bfloat16),                 # MXU operands in bf16
            w_hh.astype(jnp.bfloat16),
            (b_ih + b_hh).reshape(1, 4 * nhid),        # combined bias, folded into gates_in
        ))
    return params


def rnn_model_forward(params, tokens, hidden):
    """tokens: (T, B) int32; hidden: (h0, c0) each (nlayers, B, nhid).
    Returns decoded (T, B, ntoken), (h_n, c_n)."""
    h0_all, c0_all = hidden
    # Embedding lookup (glue; gather is not the hot path here).
    emb = jnp.take(params["encoder_w"], tokens, axis=0)   # (T, B, ninp) f32
    # Dropout: eval-mode identity.
    x = emb
    h_finals, c_finals = [], []
    for l, (w_ih, w_hh, b) in enumerate(params["lstm"]):
        x, hT, cT = lstm_layer(x, h0_all[l], c0_all[l], w_ih, w_hh, b)
        h_finals.append(hT)
        c_finals.append(cT)
    T, B, nhid = x.shape
    decoded = matmul_bias(x.reshape(T * B, nhid),
                          params["decoder_w"], params["decoder_b"])
    ntoken = decoded.shape[-1]
    return decoded.reshape(T, B, ntoken), (jnp.stack(h_finals), jnp.stack(c_finals))


if __name__ == "__main__":
    # Small but TPU-aligned shapes: seq=8, batch=8 (sublane-aligned),
    # ntoken=256, ninp=nhid=128 (lane-aligned), nlayers=2.
    T, B = 8, 8
    ntoken, ninp, nhid, nlayers = 256, 128, 128, 2

    key = jax.random.PRNGKey(0)
    kp, kt = jax.random.split(key)
    params = init_params(kp, ntoken, ninp, nhid, nlayers)

    tokens = jax.random.randint(kt, (T, B), 0, ntoken, dtype=jnp.int32)
    h0 = jnp.zeros((nlayers, B, nhid), jnp.float32)
    c0 = jnp.zeros((nlayers, B, nhid), jnp.float32)

    decoded, (h_n, c_n) = rnn_model_forward(params, tokens, (h0, c0))
    jax.block_until_ready((decoded, h_n, c_n))

    assert decoded.shape == (T, B, ntoken)
    assert h_n.shape == (nlayers, B, nhid) and c_n.shape == (nlayers, B, nhid)
    assert bool(jnp.all(jnp.isfinite(decoded)))
    print("KERNEL_OK")
</pallas_src>

<mosaic_0001>
module attributes {stable_mosaic.version = 11 : i64} {
  func.func @_matmul_bias_kernel(%arg0: i32, %arg1: i32, %arg2: i32, %arg3: memref<64x128xf32, #tpu.memory_space<vmem>>, %arg4: memref<128x512xbf16, #tpu.memory_space<vmem>>, %arg5: memref<1x512xf32, #tpu.memory_space<vmem>>, %arg6: memref<64x512xf32, #tpu.memory_space<vmem>>, %arg7: memref<64x512xf32, #tpu.memory_space<vmem>>) attributes {dimension_semantics = [#tpu.dimension_semantics<parallel>, #tpu.dimension_semantics<parallel>, #tpu.dimension_semantics<arbitrary>], iteration_bounds = array<i64: 1, 1, 1>, scalar_prefetch = 0 : i64, scratch_operands = 1 : i64, tpu.core_type = #tpu.core_type<tc>, window_params = [{transform_indices = @transform_0, window_bounds = array<i64: 64, 128>}, {transform_indices = @transform_1, window_bounds = array<i64: 128, 512>}, {transform_indices = @transform_2, window_bounds = array<i64: 1, 512>}, {transform_indices = @transform_3, window_bounds = array<i64: 64, 512>}]} {
    %c0_i32 = arith.constant 0 : i32
    %0 = arith.cmpi eq, %arg2, %c0_i32 : i32
    %1 = arith.extui %0 : i1 to i32
    %c0_i32_0 = arith.constant 0 : i32
    %2 = arith.cmpi ne, %1, %c0_i32_0 : i32
    scf.if %2 {
      %cst_10 = arith.constant 0.000000e+00 : f32
      %13 = vector.broadcast %cst_10 : f32 to vector<64x512xf32>
      %c0_11 = arith.constant 0 : index
      %c0_12 = arith.constant 0 : index
      %14 = vector.load %arg7[%c0_11, %c0_12] : memref<64x512xf32, #tpu.memory_space<vmem>>, vector<64x512xf32>
      tpu.vector_store %arg7[%c0_11, %c0_12], %13 {strides = array<i32>} : memref<64x512xf32, #tpu.memory_space<vmem>>, vector<64x512xf32>,
    } else {
    }
    %c0 = arith.constant 0 : index
    %c0_1 = arith.constant 0 : index
    %3 = vector.load %arg7[%c0, %c0_1] : memref<64x512xf32, #tpu.memory_space<vmem>>, vector<64x512xf32>
    %c0_2 = arith.constant 0 : index
    %c0_3 = arith.constant 0 : index
    %4 = vector.load %arg3[%c0_2, %c0_3] : memref<64x128xf32, #tpu.memory_space<vmem>>, vector<64x128xf32>
    %5 = arith.truncf %4 : vector<64x128xf32> to vector<64x128xbf16>
    %c0_4 = arith.constant 0 : index
    %c0_5 = arith.constant 0 : index
    %6 = vector.load %arg4[%c0_4, %c0_5] : memref<128x512xbf16, #tpu.memory_space<vmem>>, vector<128x512xbf16>
    %cst = arith.constant dense<0.000000e+00> : vector<64x512xf32>
    %7 = tpu.matmul %5, %6, %cst {dimension_numbers = #tpu.dot_dimension_numbers<[1], [0], [0], [1], [0, 0, 1, 1], [], []>} : vector<64x128xbf16>, vector<128x512xbf16>, vector<64x512xf32> -> vector<64x512xf32>
    %8 = arith.addf %3, %7 : vector<64x512xf32>
    %c0_6 = arith.constant 0 : index
    %c0_7 = arith.constant 0 : index
    %9 = vector.load %arg7[%c0_6, %c0_7] : memref<64x512xf32, #tpu.memory_space<vmem>>, vector<64x512xf32>
    tpu.vector_store %arg7[%c0_6, %c0_7], %8 {strides = array<i32>} : memref<64x512xf32, #tpu.memory_space<vmem>>, vector<64x512xf32>,
    %c0_i32_8 = arith.constant 0 : i32
    %10 = arith.cmpi eq, %arg2, %c0_i32_8 : i32
    %11 = arith.extui %10 : i1 to i32
    %c0_i32_9 = arith.constant 0 : i32
    %12 = arith.cmpi ne, %11, %c0_i32_9 : i32
    scf.if %12 {
      %c0_10 = arith.constant 0 : index
      %c0_11 = arith.constant 0 : index
      %13 = vector.load %arg7[%c0_10, %c0_11] : memref<64x512xf32, #tpu.memory_space<vmem>>, vector<64x512xf32>
      %c0_12 = arith.constant 0 : index
      %c0_13 = arith.constant 0 : index
      %14 = vector.load %arg5[%c0_12, %c0_13] : memref<1x512xf32, #tpu.memory_space<vmem>>, vector<1x512xf32>
      %15 = vector.broadcast %14 : vector<1x512xf32> to vector<64x512xf32>
      %16 = arith.addf %13, %15 : vector<64x512xf32>
      %c0_14 = arith.constant 0 : index
      %c0_15 = arith.constant 0 : index
      %17 = vector.load %arg6[%c0_14, %c0_15] : memref<64x512xf32, #tpu.memory_space<vmem>>, vector<64x512xf32>
      tpu.vector_store %arg6[%c0_14, %c0_15], %16 {strides = array<i32>} : memref<64x512xf32, #tpu.memory_space<vmem>>, vector<64x512xf32>,
    } else {
    }
    return
  }
  func.func @transform_0(%arg0: i32, %arg1: i32, %arg2: i32) -> (i32, i32) {
    %c0_i32 = arith.constant 0 : i32
    return %arg0, %arg2 : i32, i32
  }
  func.func @transform_1(%arg0: i32, %arg1: i32, %arg2: i32) -> (i32, i32) {
    %c0_i32 = arith.constant 0 : i32
    return %arg2, %arg1 : i32, i32
  }
  func.func @transform_2(%arg0: i32, %arg1: i32, %arg2: i32) -> (i32, i32) {
    %c0_i32 = arith.constant 0 : i32
    %c0_i32_0 = arith.constant 0 : i32
    return %c0_i32, %arg1 : i32, i32
  }
  func.func @transform_3(%arg0: i32, %arg1: i32, %arg2: i32) -> (i32, i32) {
    %c0_i32 = arith.constant 0 : i32
    return %arg0, %arg1 : i32, i32
  }
}

</mosaic_0001>

<bundles_post_ra>
// kernel: tpu_custom_call.1
= control target key start
LH: loop header
LB: loop body
LE: loop exit
PB: predicated region body
PF: predicated region fallthrough
CT: control target
= control target key end

     0   :  { %8 = vsyncpa [#allocation4], 0  ;;  %s944_s0 = inlined_call_operand.hbm [shape: f32[64,128], index: 0, kind: input, shape index: {}]   ;;  %s945_s1 = inlined_call_operand.hbm [shape: bf16[128,512], index: 1, kind: input, shape index: {}]   ;;  %s946_s2 = inlined_call_operand.hbm [shape: f32[1,512], index: 2, kind: input, shape index: {}]   ;;  %s947_s3 = inlined_call_operand.hbm [shape: f32[64,512], index: 3, kind: output, shape index: {}]  }
   0x1   :  { %9 = vsyncpa [#allocation7], 0 }
   0x2   :  { %10 = vsyncpa [#allocation5], 0  ;;  %s853_s12 = smov [#allocation6]  }
   0x3   :  { %s28_s13 = sshll.u32 %s853_s12, 4  ;;  %s29_s13 = int_to_ptr.vmem [resolvable:$true] %s28_s13 }
   0x4   :  { %s775_s14 = scalar_lea.vmem %s29_s13, 4096  ;;  %p780_p1 = scmp.lt.s32.totalorder %s29_s13, %s29_s13 }
   0x5   :  { %p776_p0 = scmp.ne.s32.totalorder %s29_s13, %s775_s14  ;;  %p781_p2 = scmp.lt.s32.totalorder %s775_s14, %s775_s14 }
   0x7   :  { %p782_p3 = por %p781_p2, %p780_p1 }
   0x9   :  { %p783_p4 = pnand %p782_p3, %p776_p0 }
   0xb   :  { %786 = shalt.err (!%p783_p4)
}
   0xc   :  { %s854_s15 = smov 256   ;;  %s855_s16 = smov 16  }
   0xd   :  { %34 = dma.hbm_to_vmem [thread:$0]  %s945_s1, 4096, %s29_s13, [#allocation7], %s854_s15, %s854_s15, %s855_s16  }
   0xe   :  { %s856_s19 = smov [#allocation3]  }
   0xf   :  { %s16_s20 = sshll.u32 %s856_s19, 4  ;;  %s17_s20 = int_to_ptr.vmem [resolvable:$true] %s16_s20 }
  0x10   :  { %s795_s21 = scalar_lea.vmem %s17_s20, 1024  ;;  %p800_p6 = scmp.lt.s32.totalorder %s17_s20, %s17_s20 }
  0x11   :  { %p796_p5 = scmp.ne.s32.totalorder %s17_s20, %s795_s21  ;;  %p801_p7 = scmp.lt.s32.totalorder %s795_s21, %s795_s21 }
  0x13   :  { %p802_p8 = por %p801_p7, %p800_p6 }
  0x15   :  { %p803_p9 = pnand %p802_p8, %p796_p5 }
  0x17   :  { %806 = shalt.err (!%p803_p9)
}
  0x18   :  { %s857_s22 = smov 128   ;;  %s858_s23 = smov 8  }
  0x19   :  { %22 = dma.hbm_to_vmem [thread:$0]  %s944_s0, 1024, %s17_s20, [#allocation4], %s857_s22, %s857_s22, %s858_s23  }
  0x1a   :  { %s859_s26 = smov [#allocation8]  }
  0x1b   :  { %s41_s27 = sshll.u32 %s859_s26, 4  ;;  %s42_s27 = int_to_ptr.vmem [resolvable:$true] %s41_s27 }
  0x1c   :  { %s815_s1 = scalar_lea.vmem %s42_s27, 64  ;;  %p820_p11 = scmp.lt.s32.totalorder %s42_s27, %s42_s27 }
  0x1d   :  { %p816_p10 = scmp.ne.s32.totalorder %s42_s27, %s815_s1  ;;  %p821_p12 = scmp.lt.s32.totalorder %s815_s1, %s815_s1 }
  0x1f   :  { %p822_p13 = por %p821_p12, %p820_p11 }
  0x21   :  { %p823_p0 = pnand %p822_p13, %p816_p10 }
  0x23   :  { %826 = shalt.err (!%p823_p0)
}
  0x24   :  { %44 = dma.hbm_to_vmem [thread:$0]  %s946_s2, 64, %s42_s27, [#allocation7]  }
  0x25   :  { %847 = dma.done.wait [#allocation4], 1024  }
  0x26   :  { %848 = vsyncadd [#allocation4], 4294966272 }
  0x27   :  { %849 = dma.done.wait [#allocation7], 4160  }
  0x28   :  { %850 = vsyncadd [#allocation7], 4294963136  ;;  %v860_v0 = vmov 0   ;;  %v719_v1 = vld [vmem:[#allocation6 + $0xe4] ss:$16 sps:$4 sm:$0xff]   ;;  %v124_v34 = vld [vmem:[#allocation3 + $0x8] sm:$0xff]  ;;  %v574_v45 = vlaneseq }
  0x29   :  { %359 = vmatprep.mubr.bf16.mxu0 %v860_v0  ;;  %432 = vmatprep.mubr.bf16.mxu1 %v860_v0  ;;  %v721_v2 = vld [vmem:[#allocation6 + $0xec] ss:$16 sps:$4 sm:$0xff]   ;;  %v723_v3 = vld [vmem:[#allocation6 + $0xe0] ss:$16 sps:$4 sm:$0xff]   ;;  %v724_v4 = vld [vmem:[#allocation6 + $0xe8] ss:$16 sps:$4 sm:$0xff]  }
  0x2a   :  { %327 = vmatprep.subr.bf16.mxu0 %v719_v1  ;;  %400 = vmatprep.subr.bf16.mxu1 %v721_v2  ;;  %v725_v5 = vld [vmem:[#allocation6 + $0xc4] ss:$16 sps:$4 sm:$0xff]   ;;  %v727_v6 = vld [vmem:[#allocation6 + $0xcc] ss:$16 sps:$4 sm:$0xff]   ;;  %v729_v7 = vld [vmem:[#allocation6 + $0xc0] ss:$16 sps:$4 sm:$0xff]  }
  0x2b   :  { %328 = vmatpush1.bf16.msra.mxu0 %v723_v3  ;;  %401 = vmatpush1.bf16.msra.mxu1 %v724_v4  ;;  %v730_v8 = vld [vmem:[#allocation6 + $0xc8] ss:$16 sps:$4 sm:$0xff]   ;;  %v731_v9 = vld [vmem:[#allocation6 + $0xa4] ss:$16 sps:$4 sm:$0xff]   ;;  %v733_v10 = vld [vmem:[#allocation6 + $0xac] ss:$16 sps:$4 sm:$0xff]  }
  0x2c   :  { %329 = vmatprep.subr.bf16.mxu0 %v725_v5  ;;  %402 = vmatprep.subr.bf16.mxu1 %v727_v6  ;;  %v735_v11 = vld [vmem:[#allocation6 + $0xa0] ss:$16 sps:$4 sm:$0xff]   ;;  %v736_v12 = vld [vmem:[#allocation6 + $0xa8] ss:$16 sps:$4 sm:$0xff]   ;;  %v737_v13 = vld [vmem:[#allocation6 + $0x84] ss:$16 sps:$4 sm:$0xff]  }
  0x2d   :  { %v739_v14 = vld [vmem:[#allocation6 + $0x8c] ss:$16 sps:$4 sm:$0xff]   ;;  %v741_v15 = vld [vmem:[#allocation6 + $0x80] ss:$16 sps:$4 sm:$0xff]   ;;  %v742_v16 = vld [vmem:[#allocation6 + $0x88] ss:$16 sps:$4 sm:$0xff]  }
  0x2e   :  { %v743_v17 = vld [vmem:[#allocation6 + $0x64] ss:$16 sps:$4 sm:$0xff]   ;;  %v745_v18 = vld [vmem:[#allocation6 + $0x6c] ss:$16 sps:$4 sm:$0xff]   ;;  %v747_v19 = vld [vmem:[#allocation6 + $0x60] ss:$16 sps:$4 sm:$0xff]  }
  0x2f   :  { %330 = vmatpush1.bf16.msra.mxu0 %v729_v7  ;;  %403 = vmatpush1.bf16.msra.mxu1 %v730_v8  ;;  %v748_v20 = vld [vmem:[#allocation6 + $0x68] ss:$16 sps:$4 sm:$0xff]   ;;  %v749_v21 = vld [vmem:[#allocation6 + $0x44] ss:$16 sps:$4 sm:$0xff]   ;;  %v751_v22 = vld [vmem:[#allocation6 + $0x4c] ss:$16 sps:$4 sm:$0xff]  }
  0x30   :  { %331 = vmatprep.subr.bf16.mxu0 %v731_v9  ;;  %404 = vmatprep.subr.bf16.mxu1 %v733_v10  ;;  %v753_v23 = vld [vmem:[#allocation6 + $0x40] ss:$16 sps:$4 sm:$0xff]   ;;  %v754_v24 = vld [vmem:[#allocation6 + $0x48] ss:$16 sps:$4 sm:$0xff]   ;;  %v755_v25 = vld [vmem:[#allocation6 + $0x24] ss:$16 sps:$4 sm:$0xff]  }
  0x31   :  { %v757_v26 = vld [vmem:[#allocation6 + $0x2c] ss:$16 sps:$4 sm:$0xff]   ;;  %v759_v27 = vld [vmem:[#allocation6 + $0x20] ss:$16 sps:$4 sm:$0xff]   ;;  %v760_v28 = vld [vmem:[#allocation6 + $0x28] ss:$16 sps:$4 sm:$0xff]  }
  0x32   :  { %v761_v29 = vld [vmem:[#allocation6 + $0x4] ss:$16 sps:$4 sm:$0xff]   ;;  %v763_v30 = vld [vmem:[#allocation6 + $0xc] ss:$16 sps:$4 sm:$0xff]   ;;  %v765_v31 = vld [vmem:[#allocation6] ss:$16 sps:$4 sm:$0xff]  }
  0x33   :  { %332 = vmatpush1.bf16.msra.mxu0 %v735_v11  ;;  %405 = vmatpush1.bf16.msra.mxu1 %v736_v12  ;;  %v766_v32 = vld [vmem:[#allocation6 + $0x8] ss:$16 sps:$4 sm:$0xff]   ;;  %v123_v33 = vld [vmem:[#allocation3] sm:$0xff]  ;;  %v125_v36 = vld [vmem:[#allocation3 + $0x10] sm:$0xff]  ;;  %v575_v46 = vshrl.u32 %v574_v45, 7  ;;  %s861_s0 = smov [#allocation9]  }
  0x34   :  { %333 = vmatprep.subr.bf16.mxu0 %v737_v13  ;;  %406 = vmatprep.subr.bf16.mxu1 %v739_v14  ;;  %v131_v35 = vpack.c.bf16 %v124_v34, %v123_v33  ;;  %v126_v37 = vld [vmem:[#allocation3 + $0x18] sm:$0xff]  ;;  %v127_v39 = vld [vmem:[#allocation3 + $0x20] sm:$0xff]  ;;  %v128_v40 = vld [vmem:[#allocation3 + $0x28] sm:$0xff]  ;;  %s663_s2 = sshll.u32 %s861_s0, 4  ;;  %s664_s2 = int_to_ptr.vmem [resolvable:$true] %s663_s2 }
  0x35   :  { %v132_v38 = vpack.c.bf16 %v126_v37, %v125_v36  ;;  %v133_v41 = vpack.c.bf16 %v128_v40, %v127_v39  ;;  %v129_v42 = vld [vmem:[#allocation3 + $0x30] sm:$0xff]  ;;  %v130_v43 = vld [vmem:[#allocation3 + $0x38] sm:$0xff]  ;;  %v576_v47 = vsub.s32 0, %v575_v46  ;;  %v584_v48 = vsub.s32 2, %v575_v46  ;;  %v572_v49 = vld [vmem:[#allocation8] sm:$0xf]  ;;  %p832_p2 = scmp.lt.s32.totalorder %s664_s2, %s664_s2 }
  0x36   :  { %v134_v44 = vpack.c.bf16 %v130_v43, %v129_v42  ;;  %v580_v50 = vsub.s32 1, %v575_v46  ;;  %v588_v51 = vsub.s32 3, %v575_v46  ;;  %s827_s30 = scalar_lea.vmem %s664_s2, 4096 }
  0x37   :  { %334 = vmatpush1.bf16.msra.mxu0 %v741_v15  ;;  %407 = vmatpush1.bf16.msra.mxu1 %v742_v16  ;;  %v901_v52 = vrot.slane %v572_v49, %v576_v47  ;;  %v903_v53 = vrot.slane %v572_v49, %v584_v48  ;;  %p828_p1 = scmp.ne.s32.totalorder %s664_s2, %s827_s30  ;;  %p833_p3 = scmp.lt.s32.totalorder %s827_s30, %s827_s30 }
  0x38   :  { %335 = vmatprep.subr.bf16.mxu0 %v743_v17  ;;  %408 = vmatprep.subr.bf16.mxu1 %v745_v18  ;;  %v905_v54 = vrot.slane %v572_v49, %v580_v50  ;;  %v907_v55 = vrot.slane %v572_v49, %v588_v51 }
  0x39   :  { %p834_p4 = por %p833_p3, %p832_p2 }
  0x3b   :  { %336 = vmatpush1.bf16.msra.mxu0 %v747_v19  ;;  %409 = vmatpush1.bf16.msra.mxu1 %v748_v20  ;;  %p835_p5 = pnand %p834_p4, %p828_p1 }
  0x3c   :  { %337 = vmatprep.subr.bf16.mxu0 %v749_v21  ;;  %410 = vmatprep.subr.bf16.mxu1 %v751_v22 }
  0x3f   :  { %338 = vmatpush1.bf16.msra.mxu0 %v753_v23  ;;  %411 = vmatpush1.bf16.msra.mxu1 %v754_v24 }
  0x40   :  { %339 = vmatprep.subr.bf16.mxu0 %v755_v25  ;;  %412 = vmatprep.subr.bf16.mxu1 %v757_v26 }
  0x43   :  { %340 = vmatpush1.bf16.msra.mxu0 %v759_v27  ;;  %413 = vmatpush1.bf16.msra.mxu1 %v760_v28 }
  0x44   :  { %341 = vmatprep.subr.bf16.mxu0 %v761_v29  ;;  %414 = vmatprep.subr.bf16.mxu1 %v763_v30 }
  0x47   :  { %342 = vmatpush1.bf16.msra.mxu0 %v765_v31  ;;  %415 = vmatpush1.bf16.msra.mxu1 %v766_v32 }
  0x4a   :  { %360 = vmatmul.mubr.bf16.vlgmr.msra.gmra.mxu0 %v131_v35  ;;  %433 = vmatmul.mubr.bf16.vlgmr.msra.gmra.mxu1 %v131_v35 }
  0x4b   :  { %369 = vmatprep.mubr.bf16.mxu0 %v860_v0  ;;  %442 = vmatprep.mubr.bf16.mxu1 %v860_v0 }
  0x52   :  { %370 = vmatmul.mubr.bf16.gmra.mxu0 %v132_v38  ;;  %443 = vmatmul.mubr.bf16.gmra.mxu1 %v132_v38 }
  0x53   :  { %379 = vmatprep.mubr.bf16.mxu0 %v860_v0  ;;  %452 = vmatprep.mubr.bf16.mxu1 %v860_v0 }
  0x5a   :  { %380 = vmatmul.mubr.bf16.gmra.mxu0 %v133_v41  ;;  %453 = vmatmul.mubr.bf16.gmra.mxu1 %v133_v41 }
  0x5b   :  { %389 = vmatprep.mubr.bf16.mxu0 %v860_v0  ;;  %462 = vmatprep.mubr.bf16.mxu1 %v860_v0 }
  0x62   :  { %390 = vmatmul.mubr.bf16.gmra.mxu0 %v134_v44  ;;  %463 = vmatmul.mubr.bf16.gmra.mxu1 %v134_v44 }
 0x10a   :  { %v361_v56 = vpop.f32.mrf.mxu0  ;;  %v434_v57 = vpop.f32.mrf.mxu1 }
 0x10b   :  { %v594_v58 = vadd.f32 %v901_v52, %v361_v56  ;;  %v596_v59 = vadd.f32 %v903_v53, %v434_v57 }
 0x10c   :  { %v363_v60 = vpop.f32.mrf.mxu0  ;;  %v436_v61 = vpop.f32.mrf.mxu1 }
 0x10d   :  { %626 = vst [vmem:[#allocation9] sm:$0xff] %v594_v58  ;;  %628 = vst [vmem:[#allocation9 + $0x10] sm:$0xff] %v596_v59  ;;  %v595_v62 = vadd.f32 %v905_v54, %v363_v60  ;;  %v597_v63 = vadd.f32 %v907_v55, %v436_v61 }
 0x10e   :  { %v365_v0 = vpop.f32.mrf.mxu0  ;;  %v438_v1 = vpop.f32.mrf.mxu1 }
 0x10f   :  { %627 = vst [vmem:[#allocation9 + $0x8] sm:$0xff] %v595_v62  ;;  %629 = vst [vmem:[#allocation9 + $0x18] sm:$0xff] %v597_v63  ;;  %v598_v2 = vadd.f32 %v901_v52, %v365_v0  ;;  %v600_v3 = vadd.f32 %v903_v53, %v438_v1 }
 0x110   :  { %v367_v4 = vpop.f32.mrf.mxu0  ;;  %v440_v5 = vpop.f32.mrf.mxu1 }
 0x111   :  { %630 = vst [vmem:[#allocation9 + $0x20] sm:$0xff] %v598_v2  ;;  %632 = vst [vmem:[#allocation9 + $0x30] sm:$0xff] %v600_v3  ;;  %v599_v6 = vadd.f32 %v905_v54, %v367_v4  ;;  %v601_v7 = vadd.f32 %v907_v55, %v440_v5 }
 0x112   :  { %v371_v8 = vpop.f32.mrf.mxu0  ;;  %v444_v9 = vpop.f32.mrf.mxu1 }
 0x113   :  { %631 = vst [vmem:[#allocation9 + $0x28] sm:$0xff] %v599_v6  ;;  %633 = vst [vmem:[#allocation9 + $0x38] sm:$0xff] %v601_v7  ;;  %v602_v10 = vadd.f32 %v901_v52, %v371_v8  ;;  %v604_v11 = vadd.f32 %v903_v53, %v444_v9 }
 0x114   :  { %v373_v12 = vpop.f32.mrf.mxu0  ;;  %v446_v13 = vpop.f32.mrf.mxu1 }
 0x115   :  { %634 = vst [vmem:[#allocation9 + $0x40] sm:$0xff] %v602_v10  ;;  %636 = vst [vmem:[#allocation9 + $0x50] sm:$0xff] %v604_v11  ;;  %v603_v14 = vadd.f32 %v905_v54, %v373_v12  ;;  %v605_v15 = vadd.f32 %v907_v55, %v446_v13 }
 0x116   :  { %v375_v16 = vpop.f32.mrf.mxu0  ;;  %v448_v17 = vpop.f32.mrf.mxu1 }
 0x117   :  { %635 = vst [vmem:[#allocation9 + $0x48] sm:$0xff] %v603_v14  ;;  %637 = vst [vmem:[#allocation9 + $0x58] sm:$0xff] %v605_v15  ;;  %v606_v18 = vadd.f32 %v901_v52, %v375_v16  ;;  %v608_v19 = vadd.f32 %v903_v53, %v448_v17 }
 0x118   :  { %v377_v20 = vpop.f32.mrf.mxu0  ;;  %v450_v21 = vpop.f32.mrf.mxu1 }
 0x119   :  { %638 = vst [vmem:[#allocation9 + $0x60] sm:$0xff] %v606_v18  ;;  %640 = vst [vmem:[#allocation9 + $0x70] sm:$0xff] %v608_v19  ;;  %v607_v22 = vadd.f32 %v905_v54, %v377_v20  ;;  %v609_v23 = vadd.f32 %v907_v55, %v450_v21 }
 0x11a   :  { %v381_v24 = vpop.f32.mrf.mxu0  ;;  %v454_v25 = vpop.f32.mrf.mxu1 }
 0x11b   :  { %639 = vst [vmem:[#allocation9 + $0x68] sm:$0xff] %v607_v22  ;;  %641 = vst [vmem:[#allocation9 + $0x78] sm:$0xff] %v609_v23  ;;  %v610_v26 = vadd.f32 %v901_v52, %v381_v24  ;;  %v612_v27 = vadd.f32 %v903_v53, %v454_v25 }
 0x11c   :  { %v383_v28 = vpop.f32.mrf.mxu0  ;;  %v456_v29 = vpop.f32.mrf.mxu1 }
 0x11d   :  { %642 = vst [vmem:[#allocation9 + $0x80] sm:$0xff] %v610_v26  ;;  %644 = vst [vmem:[#allocation9 + $0x90] sm:$0xff] %v612_v27  ;;  %v611_v30 = vadd.f32 %v905_v54, %v383_v28  ;;  %v613_v31 = vadd.f32 %v907_v55, %v456_v29 }
 0x11e   :  { %v385_v32 = vpop.f32.mrf.mxu0  ;;  %v458_v33 = vpop.f32.mrf.mxu1 }
 0x11f   :  { %643 = vst [vmem:[#allocation9 + $0x88] sm:$0xff] %v611_v30  ;;  %645 = vst [vmem:[#allocation9 + $0x98] sm:$0xff] %v613_v31  ;;  %v614_v34 = vadd.f32 %v901_v52, %v385_v32  ;;  %v616_v35 = vadd.f32 %v903_v53, %v458_v33 }
 0x120   :  { %v387_v36 = vpop.f32.mrf.mxu0  ;;  %v460_v37 = vpop.f32.mrf.mxu1 }
 0x121   :  { %646 = vst [vmem:[#allocation9 + $0xa0] sm:$0xff] %v614_v34  ;;  %648 = vst [vmem:[#allocation9 + $0xb0] sm:$0xff] %v616_v35  ;;  %v615_v38 = vadd.f32 %v905_v54, %v387_v36  ;;  %v617_v39 = vadd.f32 %v907_v55, %v460_v37 }
 0x122   :  { %v391_v40 = vpop.f32.mrf.mxu0  ;;  %v464_v41 = vpop.f32.mrf.mxu1 }
 0x123   :  { %647 = vst [vmem:[#allocation9 + $0xa8] sm:$0xff] %v615_v38  ;;  %649 = vst [vmem:[#allocation9 + $0xb8] sm:$0xff] %v617_v39  ;;  %v618_v42 = vadd.f32 %v901_v52, %v391_v40  ;;  %v620_v43 = vadd.f32 %v903_v53, %v464_v41 }
 0x124   :  { %v393_v44 = vpop.f32.mrf.mxu0  ;;  %v466_v45 = vpop.f32.mrf.mxu1 }
 0x125   :  { %650 = vst [vmem:[#allocation9 + $0xc0] sm:$0xff] %v618_v42  ;;  %652 = vst [vmem:[#allocation9 + $0xd0] sm:$0xff] %v620_v43  ;;  %v619_v46 = vadd.f32 %v905_v54, %v393_v44  ;;  %v621_v47 = vadd.f32 %v907_v55, %v466_v45 }
 0x126   :  { %v395_v48 = vpop.f32.mrf.mxu0  ;;  %v468_v49 = vpop.f32.mrf.mxu1 }
 0x127   :  { %651 = vst [vmem:[#allocation9 + $0xc8] sm:$0xff] %v619_v46  ;;  %653 = vst [vmem:[#allocation9 + $0xd8] sm:$0xff] %v621_v47  ;;  %v622_v50 = vadd.f32 %v901_v52, %v395_v48  ;;  %v624_v51 = vadd.f32 %v903_v53, %v468_v49 }
 0x128   :  { %v397_v56 = vpop.f32.mrf.mxu0  ;;  %v470_v57 = vpop.f32.mrf.mxu1 }
 0x129   :  { %654 = vst [vmem:[#allocation9 + $0xe0] sm:$0xff] %v622_v50  ;;  %656 = vst [vmem:[#allocation9 + $0xf0] sm:$0xff] %v624_v51  ;;  %v623_v58 = vadd.f32 %v905_v54, %v397_v56  ;;  %v625_v59 = vadd.f32 %v907_v55, %v470_v57 }
 0x12b   :  { %655 = vst [vmem:[#allocation9 + $0xe8] sm:$0xff] %v623_v58  ;;  %657 = vst [vmem:[#allocation9 + $0xf8] sm:$0xff] %v625_v59 }
 0x12c   :  { %838 = shalt.err (!%p835_p5)
}
 0x12d   :  { %s862_s4 = smov 512   ;;  %s863_s5 = smov 32  }
 0x12e   :  { %669 = dma.vmem_to_hbm [thread:$0]  %s664_s2, 4096, %s947_s3, [#allocation5], %s862_s4, %s862_s4, %s863_s5  }
 0x12f   :  { %851 = dma.done.wait [#allocation5], 4096  }
 0x130   :  { %852 = vsyncadd [#allocation5], 4294963200 }
 0x131   :  { %673 = vsyncpa [#allocation4], 1 }
 0x132   :  { %674 = vsyncpa [#allocation7], 1 }
 0x133   :  { %675 = vsyncpa [#allocation5], 1 }

</bundles_post_ra>
